<compile_context>
chip_gen: v7x
topology: tpu7x:2x2x1
jax: 0.10.0
libtpu: 0.0.40
codegen_flags: <defaults>
</compile_context>

<pallas_src>
import functools
from typing import NamedTuple

import jax
import jax.numpy as jnp
from jax.experimental import pallas as pl
from jax.experimental.pallas import tpu as pltpu


# Large finite negative used to mask padded memory slots.  Safe because
# mem_size >= 1 is guaranteed on the kernel path, so at least one real logit
# exists per row and the softmax denominator cannot underflow to 0.
_NEG_INF = -1e30


def _round_up(x: int, m: int) -> int:
    return ((x + m - 1) // m) * m


def _sublane_pack(dtype) -> int:
    # second-minor tiling: 8 rows for 4-byte, 16 for 2-byte, 32 for 1-byte.
    return 8 * (4 // jnp.dtype(dtype).itemsize)


def _block_spec(shape, index_map, buffer_count=None):
    """BlockSpec with optional explicit buffer count (falls back gracefully)."""
    if buffer_count is not None:
        try:
            return pl.BlockSpec(shape, index_map,
                                pipeline_mode=pl.Buffered(buffer_count))
        except (TypeError, AttributeError):
            pass
    return pl.BlockSpec(shape, index_map)


class PreparedMemory(NamedTuple):
    keys: jax.Array      # (mp, kp) padded, cast to matmul dtype
    values: jax.Array    # (mp, vp) padded, cast to matmul dtype
    mem_size: int
    key_dim: int
    value_dim: int


def prepare_memory(keys, values, matmul_dtype=jnp.bfloat16) -> PreparedMemory:
    """Pad/cast the episodic memory once (done at write() time in real use).

    key/value feature dims are padded to 128 (lane axis); the memory axis is
    padded only to the sublane pack of the storage dtype.
    """
    mem_size, key_dim = keys.shape
    mem_size_v, value_dim = values.shape
    assert mem_size == mem_size_v
    if matmul_dtype is None:
        matmul_dtype = keys.dtype
    # TODO(synk): on v7x an fp8 (e4m3) storage dtype can be passed here for
    # another ~2x on K/V footprint and MXU throughput (accuracy-gated).
    kp = _round_up(max(key_dim, 1), 128)
    vp = _round_up(max(value_dim, 1), 128)
    pack = _sublane_pack(matmul_dtype)
    mp = _round_up(max(mem_size, 1), pack)
    k_p = (jnp.zeros((mp, kp), matmul_dtype)
           .at[:mem_size, :key_dim].set(keys.astype(matmul_dtype)))
    v_p = (jnp.zeros((mp, vp), matmul_dtype)
           .at[:mem_size, :value_dim].set(values.astype(matmul_dtype)))
    return PreparedMemory(k_p, v_p, mem_size, key_dim, value_dim)


# ----------------------------------------------------------------------------
# Kernels
# ----------------------------------------------------------------------------
def _uhn_resident_kernel(q_ref, k_ref, v_ref, o_ref, *, mem_size, mem_padded,
                         mm_dtype, approx_recip):
    # beta was folded into the f32 query pad in the wrapper.
    q = q_ref[...].astype(mm_dtype)

    # sim = q @ keys.T as a contraction over the last dim of both operands
    # (no transposed copy of the keys block).                       (MXU)
    sim = jax.lax.dot_general(
        q, k_ref[...],
        dimension_numbers=(((1,), (1,)), ((), ())),
        preferred_element_type=jnp.float32,
    )

    # Mask padded memory slots; static branch, dead code when no padding.
    if mem_size < mem_padded:
        slot = jax.lax.broadcasted_iota(jnp.int32, sim.shape, 1)
        sim = jnp.where(slot < mem_size, sim, _NEG_INF)

    # Max-stabilised softmax in f32 (VPU + EUP).
    m = jnp.max(sim, axis=-1, keepdims=True)
    p = jnp.exp(sim - m)
    denom = jnp.sum(p, axis=-1, keepdims=True)
    sep = p * pl.reciprocal(denom, approx=approx_recip)

    # out = sep @ values                                            (MXU)
    o_ref[...] = jnp.dot(
        sep.astype(mm_dtype), v_ref[...], preferred_element_type=jnp.float32
    ).astype(o_ref.dtype)


def _uhn_online_kernel(q_ref, k_ref, v_ref, o_ref, m_sc, l_sc, acc_sc, *,
                       mem_size, tile_m, mm_dtype, approx_recip, needs_mask):
    k_idx = pl.program_id(1)

    @pl.when(k_idx == 0)
    def _():
        m_sc[...] = jnp.full_like(m_sc, _NEG_INF)
        l_sc[...] = jnp.zeros_like(l_sc)
        acc_sc[...] = jnp.zeros_like(acc_sc)

    q = q_ref[...].astype(mm_dtype)
    sim = jax.lax.dot_general(
        q, k_ref[...],
        dimension_numbers=(((1,), (1,)), ((), ())),
        preferred_element_type=jnp.float32,
    )

    if needs_mask:
        slot = k_idx * tile_m + jax.lax.broadcasted_iota(jnp.int32, sim.shape, 1)
        sim = jnp.where(slot < mem_size, sim, _NEG_INF)

    m_prev = m_sc[...]
    m_new = jnp.maximum(m_prev, jnp.max(sim, axis=-1, keepdims=True))
    alpha = jnp.exp(m_prev - m_new)
    p = jnp.exp(sim - m_new)
    l_sc[...] = alpha * l_sc[...] + jnp.sum(p, axis=-1, keepdims=True)
    acc_sc[...] = alpha * acc_sc[...] + jnp.dot(
        p.astype(mm_dtype), v_ref[...], preferred_element_type=jnp.float32)
    m_sc[...] = m_new

    @pl.when(k_idx == pl.num_programs(1) - 1)
    def _():
        o_ref[...] = (acc_sc[...] *
                      pl.reciprocal(l_sc[...], approx=approx_recip)
                      ).astype(o_ref.dtype)


# ----------------------------------------------------------------------------
# Forward
# ----------------------------------------------------------------------------
def uhn_forward(query, memory: PreparedMemory, *, beta=1.0, tile_b=None,
                mem_tile=None, force_online=False,
                resident_kv_limit_bytes=24 << 20):
    """softmax(beta * query @ keys.T) @ values on prepared (padded) memory."""
    B, key_dim = query.shape
    assert key_dim == memory.key_dim
    value_dim = memory.value_dim

    if memory.mem_size == 0:
        # (B, 0) @ (0, V) == zeros -- matches the PyTorch module's empty case.
        return jnp.zeros((B, value_dim), query.dtype)

    mp, kp = memory.keys.shape
    _, vp = memory.values.shape
    mm_dtype = memory.keys.dtype
    mm_bytes = jnp.dtype(mm_dtype).itemsize
    io_bytes = jnp.dtype(query.dtype).itemsize
    mem_size = memory.mem_size
    approx_recip = jnp.dtype(mm_dtype) != jnp.dtype(jnp.float32)

    # ---- batch tiling -------------------------------------------------------
    bp8 = _round_up(B, 8)
    if tile_b is None:
        # Single grid step for small batches (the grid is a serial loop on
        # single-TC v5e/v6e); 256-row tiles otherwise (fills the 2x256x256 MXU
        # on v6e/v7x and still yields >=2 parallel steps for v7x megacore).
        # On v5e a caller may prefer tile_b=128 (4x128x128 MXU).
        tile_b = bp8 if bp8 <= 256 else 256
    tile_b = max(8, _round_up(tile_b, 8))
    bp = _round_up(bp8, tile_b)

    # beta folded into the f32 query pad (no per-step VPU multiply in-kernel).
    q_src = query if beta == 1.0 else query * jnp.asarray(beta, query.dtype)
    q_p = jnp.zeros((bp, kp), query.dtype).at[:B, :key_dim].set(q_src)

    kv_bytes = (mp * kp + mp * vp) * mm_bytes
    logits_bytes = tile_b * mp * 4
    use_online = (force_online
                  or kv_bytes > resident_kv_limit_bytes
                  or logits_bytes > (8 << 20))

    if not use_online:
        # -------- small/medium memory: K/V fully resident (single-buffered) --
        usage = (kv_bytes                              # K+V, Buffered(1)
                 + 2 * tile_b * kp * io_bytes          # q double-buffered
                 + 2 * tile_b * vp * io_bytes          # out double-buffered
                 + tile_b * mp * (4 + mm_bytes))       # sim f32 + sep cast
        vmem_limit = int(min(max(usage * 3 // 2 + (4 << 20), 16 << 20),
                             96 << 20))
        cost = pl.CostEstimate(
            flops=2 * bp * mp * (kp + vp),
            transcendentals=bp * mp,
            bytes_accessed=(bp * kp * io_bytes + kv_bytes
                            + bp * vp * io_bytes),
        )
        kernel = functools.partial(
            _uhn_resident_kernel, mem_size=mem_size, mem_padded=mp,
            mm_dtype=mm_dtype, approx_recip=approx_recip)

        out_p = pl.pallas_call(
            kernel,
            out_shape=jax.ShapeDtypeStruct((bp, vp), query.dtype),
            grid_spec=pltpu.PrefetchScalarGridSpec(
                num_scalar_prefetch=0,
                grid=(bp // tile_b,),
                in_specs=[
                    pl.BlockSpec((tile_b, kp), lambda i: (i, 0)),
                    # Constant index_map -> no point double-buffering.
                    _block_spec((mp, kp), lambda i: (0, 0), buffer_count=1),
                    _block_spec((mp, vp), lambda i: (0, 0), buffer_count=1),
                ],
                out_specs=pl.BlockSpec((tile_b, vp), lambda i: (i, 0)),
            ),
            compiler_params=pltpu.CompilerParams(
                dimension_semantics=("parallel",),
                vmem_limit_bytes=vmem_limit,
            ),
            cost_estimate=cost,
        )(q_p, memory.keys, memory.values)
        return out_p[:B, :value_dim]

    # -------- large memory: online softmax over a trailing mem grid axis -----
    pack = _sublane_pack(mm_dtype)
    if mem_tile is None:
        # Largest multiple of the sublane pack <= 512 that divides mp, so no
        # re-padding of the prepared memory is needed.
        mem_tile = min(512, mp)
        mem_tile = max(pack, (mem_tile // pack) * pack)
        while mem_tile > pack and mp % mem_tile != 0:
            mem_tile -= pack
    mem_tile = max(pack, _round_up(mem_tile, pack))
    mem_tile = min(mem_tile, mp)

    mp_online = _round_up(mp, mem_tile)
    k_mem, v_mem = memory.keys, memory.values
    if mp_online != mp:   # only if an explicit mem_tile does not divide mp
        k_mem = jnp.zeros((mp_online, kp), mm_dtype).at[:mp].set(k_mem)
        v_mem = jnp.zeros((mp_online, vp), mm_dtype).at[:mp].set(v_mem)
    needs_mask = mem_size < mp_online

    usage = (2 * (mem_tile * kp + mem_tile * vp) * mm_bytes  # K/V dbl-buffered
             + 2 * tile_b * kp * io_bytes
             + 2 * tile_b * vp * io_bytes
             + tile_b * mem_tile * (4 + mm_bytes)             # sim + p cast
             + tile_b * (vp + 2) * 4)                         # m/l/acc scratch
    vmem_limit = int(min(max(usage * 3 // 2 + (4 << 20), 16 << 20), 96 << 20))

    n_batch_tiles = bp // tile_b
    cost = pl.CostEstimate(
        flops=2 * bp * mp_online * (kp + vp),
        transcendentals=bp * mp_online,
        bytes_accessed=(bp * kp * io_bytes
                        + n_batch_tiles * mp_online * (kp + vp) * mm_bytes
                        + bp * vp * io_bytes),
    )
    kernel = functools.partial(
        _uhn_online_kernel, mem_size=mem_size, tile_m=mem_tile,
        mm_dtype=mm_dtype, approx_recip=approx_recip, needs_mask=needs_mask)

    out_p = pl.pallas_call(
        kernel,
        out_shape=jax.ShapeDtypeStruct((bp, vp), query.dtype),
        grid_spec=pltpu.PrefetchScalarGridSpec(
            num_scalar_prefetch=0,
            grid=(n_batch_tiles, mp_online // mem_tile),
            in_specs=[
                pl.BlockSpec((tile_b, kp), lambda i, k: (i, 0)),
                pl.BlockSpec((mem_tile, kp), lambda i, k: (k, 0)),
                pl.BlockSpec((mem_tile, vp), lambda i, k: (k, 0)),
            ],
            out_specs=pl.BlockSpec((tile_b, vp), lambda i, k: (i, 0)),
            scratch_shapes=[
                pltpu.VMEM((tile_b, 1), jnp.float32),   # running max
                pltpu.VMEM((tile_b, 1), jnp.float32),   # running denom
                pltpu.VMEM((tile_b, vp), jnp.float32),  # running numerator
            ],
        ),
        compiler_params=pltpu.CompilerParams(
            dimension_semantics=("parallel", "arbitrary"),
            vmem_limit_bytes=vmem_limit,
        ),
        cost_estimate=cost,
    )(q_p, k_mem, v_mem)
    return out_p[:B, :value_dim]


def local_episodic_mem_uhn(query, keys, values, *, beta=1.0,
                           matmul_dtype=jnp.bfloat16, **kwargs):
    """Convenience one-shot wrapper (pads/casts memory on every call)."""
    return uhn_forward(query, prepare_memory(keys, values, matmul_dtype),
                       beta=beta, **kwargs)


def _reference(query, keys, values, beta=1.0):
    sim = query @ keys.T
    sep = jax.nn.softmax(beta * sim, axis=-1)
    return sep @ values


if __name__ == "__main__":
    # TODO(synk): write()/mem_writing_index()/unprocessed_seps are stateful
    # host-side bookkeeping, not part of forward(); they stay outside the
    # kernel (prepare_memory would be called once at write() time).
    key = jax.random.PRNGKey(0)
    kq, kk, kv, kq2, kk2, kv2 = jax.random.split(key, 6)

    # ---- demo 1: small memory (resident path), mask exercised (13 < pad) ----
    B, KEY_DIM, VALUE_DIM, MEM_SIZE = 8, 32, 32, 13
    BETA = 1.0
    query = jax.random.normal(kq, (B, KEY_DIM), dtype=jnp.float32)
    mem_keys = jax.random.normal(kk, (MEM_SIZE, KEY_DIM), dtype=jnp.float32)
    mem_values = jax.random.normal(kv, (MEM_SIZE, VALUE_DIM), dtype=jnp.float32)
    ref = _reference(query, mem_keys, mem_values, beta=BETA)

    mem_f32 = prepare_memory(mem_keys, mem_values, jnp.float32)
    out_f32 = jax.block_until_ready(uhn_forward(query, mem_f32, beta=BETA))
    assert out_f32.shape == (B, VALUE_DIM)
    assert jnp.allclose(out_f32, ref, atol=1e-5, rtol=1e-5)

    mem_bf16 = prepare_memory(mem_keys, mem_values, jnp.bfloat16)
    out_bf16 = jax.block_until_ready(uhn_forward(query, mem_bf16, beta=BETA))
    assert out_bf16.shape == (B, VALUE_DIM)
    assert jnp.allclose(out_bf16, ref, atol=2e-1, rtol=5e-2)

    # ---- demo 2: larger memory, online-softmax path (forced) ----------------
    B2, KEY_DIM2, VALUE_DIM2, MEM_SIZE2 = 16, 32, 48, 380
    BETA2 = 0.7
    query2 = jax.random.normal(kq2, (B2, KEY_DIM2), dtype=jnp.float32)
    keys2 = jax.random.normal(kk2, (MEM_SIZE2, KEY_DIM2), dtype=jnp.float32)
    values2 = jax.random.normal(kv2, (MEM_SIZE2, VALUE_DIM2), dtype=jnp.float32)
    ref2 = _reference(query2, keys2, values2, beta=BETA2)

    mem2_f32 = prepare_memory(keys2, values2, jnp.float32)
    out2_res = jax.block_until_ready(uhn_forward(query2, mem2_f32, beta=BETA2))
    assert jnp.allclose(out2_res, ref2, atol=1e-5, rtol=1e-5)

    out2_onl = jax.block_until_ready(
        uhn_forward(query2, mem2_f32, beta=BETA2,
                    force_online=True, mem_tile=128))
    assert out2_onl.shape == (B2, VALUE_DIM2)
    assert jnp.allclose(out2_onl, ref2, atol=1e-4, rtol=1e-4)

    mem2_bf16 = prepare_memory(keys2, values2, jnp.bfloat16)
    out2_bf = jax.block_until_ready(
        uhn_forward(query2, mem2_bf16, beta=BETA2,
                    force_online=True, mem_tile=128))
    assert jnp.allclose(out2_bf, ref2, atol=2e-1, rtol=5e-2)

    # ---- empty memory (has_slots=False, nothing written yet) ----------------
    empty = prepare_memory(jnp.zeros((0, KEY_DIM), jnp.float32),
                           jnp.zeros((0, VALUE_DIM), jnp.float32), jnp.float32)
    out_e = jax.block_until_ready(uhn_forward(query, empty, beta=BETA))
    assert out_e.shape == (B, VALUE_DIM)
    assert bool(jnp.all(out_e == 0))

    print("KERNEL_OK")
</pallas_src>

<mosaic_0001>
module attributes {stable_mosaic.version = 11 : i64} {
  func.func @_uhn_resident_kernel(%arg0: i32, %arg1: memref<8x128xf32, #tpu.memory_space<vmem>>, %arg2: memref<16x128xf32, #tpu.memory_space<vmem>>, %arg3: memref<16x128xf32, #tpu.memory_space<vmem>>, %arg4: memref<8x128xf32, #tpu.memory_space<vmem>>) attributes {dimension_semantics = [#tpu.dimension_semantics<parallel>], iteration_bounds = array<i64: 1>, scalar_prefetch = 0 : i64, scratch_operands = 0 : i64, tpu.core_type = #tpu.core_type<tc>, window_params = [{transform_indices = @transform_0, window_bounds = array<i64: 8, 128>}, {pipeline_mode = #tpu.pipeline_mode<synchronous>, transform_indices = @transform_1, window_bounds = array<i64: 16, 128>}, {pipeline_mode = #tpu.pipeline_mode<synchronous>, transform_indices = @transform_2, window_bounds = array<i64: 16, 128>}, {transform_indices = @transform_3, window_bounds = array<i64: 8, 128>}]} {
    %c0 = arith.constant 0 : index
    %c0_0 = arith.constant 0 : index
    %0 = vector.load %arg1[%c0, %c0_0] : memref<8x128xf32, #tpu.memory_space<vmem>>, vector<8x128xf32>
    %c0_1 = arith.constant 0 : index
    %c0_2 = arith.constant 0 : index
    %1 = vector.load %arg2[%c0_1, %c0_2] : memref<16x128xf32, #tpu.memory_space<vmem>>, vector<16x128xf32>
    %cst = arith.constant dense<0.000000e+00> : vector<8x16xf32>
    %2 = tpu.matmul %0, %1, %cst {dimension_numbers = #tpu.dot_dimension_numbers<[1], [1], [0], [0], [0, 0, 1, 0], [], []>} : vector<8x128xf32>, vector<16x128xf32>, vector<8x16xf32> -> vector<8x16xf32>
    %3 = tpu.iota {dimensions = array<i32: 1>} : vector<8x16xi32>
    %c13_i32 = arith.constant 13 : i32
    %4 = vector.broadcast %c13_i32 : i32 to vector<8x16xi32>
    %5 = arith.cmpi slt, %3, %4 : vector<8x16xi32>
    %cst_3 = arith.constant -1.000000e+30 : f32
    %6 = vector.broadcast %cst_3 : f32 to vector<8x16xf32>
    %7 = arith.select %5, %2, %6 : vector<8x16xi1>, vector<8x16xf32>
    %cst_4 = arith.constant dense<0xFF800000> : vector<8xf32>
    %8 = vector.multi_reduction <maximumf>, %7, %cst_4 [1] : vector<8x16xf32> to vector<8xf32>
    %9 = vector.shape_cast %8 : vector<8xf32> to vector<8x1xf32>
    %10 = vector.broadcast %9 : vector<8x1xf32> to vector<8x16xf32>
    %11 = arith.subf %7, %10 : vector<8x16xf32>
    %12 = math.exp %11 : vector<8x16xf32>
    %cst_5 = arith.constant dense<0.000000e+00> : vector<8xf32>
    %13 = vector.multi_reduction <add>, %12, %cst_5 [1] : vector<8x16xf32> to vector<8xf32>
    %14 = vector.shape_cast %13 : vector<8xf32> to vector<8x1xf32>
    %15 = tpu.reciprocal %14 : vector<8x1xf32> -> vector<8x1xf32>
    %16 = vector.broadcast %15 : vector<8x1xf32> to vector<8x16xf32>
    %17 = arith.mulf %12, %16 : vector<8x16xf32>
    %c0_6 = arith.constant 0 : index
    %c0_7 = arith.constant 0 : index
    %18 = vector.load %arg3[%c0_6, %c0_7] : memref<16x128xf32, #tpu.memory_space<vmem>>, vector<16x128xf32>
    %cst_8 = arith.constant dense<0.000000e+00> : vector<8x128xf32>
    %19 = tpu.matmul %17, %18, %cst_8 {dimension_numbers = #tpu.dot_dimension_numbers<[1], [0], [0], [1], [0, 0, 1, 1], [], []>} : vector<8x16xf32>, vector<16x128xf32>, vector<8x128xf32> -> vector<8x128xf32>
    %c0_9 = arith.constant 0 : index
    %c0_10 = arith.constant 0 : index
    %20 = vector.load %arg4[%c0_9, %c0_10] : memref<8x128xf32, #tpu.memory_space<vmem>>, vector<8x128xf32>
    tpu.vector_store %arg4[%c0_9, %c0_10], %19 {strides = array<i32>} : memref<8x128xf32, #tpu.memory_space<vmem>>, vector<8x128xf32>,
    return
  }
  func.func @transform_0(%arg0: i32) -> (i32, i32) {
    %c0_i32 = arith.constant 0 : i32
    %c0_i32_0 = arith.constant 0 : i32
    return %arg0, %c0_i32 : i32, i32
  }
  func.func @transform_1(%arg0: i32) -> (i32, i32) {
    %c0_i32 = arith.constant 0 : i32
    %c0_i32_0 = arith.constant 0 : i32
    %c0_i32_1 = arith.constant 0 : i32
    return %c0_i32, %c0_i32_0 : i32, i32
  }
  func.func @transform_2(%arg0: i32) -> (i32, i32) {
    %c0_i32 = arith.constant 0 : i32
    %c0_i32_0 = arith.constant 0 : i32
    %c0_i32_1 = arith.constant 0 : i32
    return %c0_i32, %c0_i32_0 : i32, i32
  }
  func.func @transform_3(%arg0: i32) -> (i32, i32) {
    %c0_i32 = arith.constant 0 : i32
    %c0_i32_0 = arith.constant 0 : i32
    return %arg0, %c0_i32 : i32, i32
  }
}

</mosaic_0001>

<bundles_post_ra>
// kernel: tpu_custom_call.1
= control target key start
LH: loop header
LB: loop body
LE: loop exit
PB: predicated region body
PF: predicated region fallthrough
CT: control target
= control target key end

     0   :  { %8 = vsyncpa [#allocation3], 0  ;;  %s455_s0 = inlined_call_operand.hbm [shape: f32[8,128], index: 0, kind: input, shape index: {}]   ;;  %s456_s1 = inlined_call_operand.hbm [shape: f32[16,128], index: 1, kind: input, shape index: {}]   ;;  %s457_s2 = inlined_call_operand.hbm [shape: f32[16,128], index: 2, kind: input, shape index: {}]   ;;  %s458_s3 = inlined_call_operand.hbm [shape: f32[8,128], index: 3, kind: output, shape index: {}]  }
   0x1   :  { %9 = vsyncpa [#allocation6], 0 }
   0x2   :  { %10 = vsyncpa [#allocation4], 0  ;;  %s369_s12 = smov [#allocation5]   ;;  %s275_s16 = scalar_lea.hbm %s456_s1, 256 }
   0x3   :  { %s26_s13 = sshll.u32 %s369_s12, 4  ;;  %p276_p0 = scmp.ne.s32.totalorder %s456_s1, %s275_s16  ;;  %s27_s13 = int_to_ptr.vmem [resolvable:$true] %s26_s13 }
   0x4   :  { %p279_p1 = scmp.lt.u32.totalorder %s275_s16, %s456_s1 }
   0x6   :  { %p281_p2 = pnand %p279_p1, %p276_p0 }
   0x8   :  { %284 = shalt.err (!%p281_p2)
}
   0x9   :  { %s285_s21 = scalar_lea.vmem %s27_s13, 256  ;;  %p290_p4 = scmp.lt.s32.totalorder %s27_s13, %s27_s13 }
   0xa   :  { %p286_p3 = scmp.ne.s32.totalorder %s27_s13, %s285_s21  ;;  %p291_p5 = scmp.lt.s32.totalorder %s285_s21, %s285_s21 }
   0xc   :  { %p292_p6 = por %p291_p5, %p290_p4 }
   0xe   :  { %p293_p7 = pnand %p292_p6, %p286_p3 }
  0x10   :  { %296 = shalt.err (!%p293_p7)
}
  0x11   :  { %s370_s22 = smov 128   ;;  %s371_s23 = smov 8  }
  0x12   :  { %32 = dma.hbm_to_vmem [thread:$0]  %s456_s1, 256, %s27_s13, [#allocation6], %s370_s22, %s370_s22, %s371_s23  }
  0x13   :  { %s372_s26 = smov [#allocation2]   ;;  %s373_s28 = smov [#allocation7]  }
  0x14   :  { %s17_s27 = sshll.u32 %s372_s26, 4  ;;  %s38_s29 = sshll.u32 %s373_s28, 4  ;;  %s18_s27 = int_to_ptr.vmem [resolvable:$true] %s17_s27  ;;  %s39_s29 = int_to_ptr.vmem [resolvable:$true] %s38_s29 }
  0x15   :  { %s297_s5 = scalar_lea.hbm %s455_s0, 128 }
  0x16   :  { %p298_p8 = scmp.ne.s32.totalorder %s455_s0, %s297_s5  ;;  %p301_p9 = scmp.lt.u32.totalorder %s297_s5, %s455_s0 }
  0x18   :  { %p303_p10 = pnand %p301_p9, %p298_p8 }
  0x1a   :  { %306 = shalt.err (!%p303_p10)
}
  0x1b   :  { %s307_s1 = scalar_lea.vmem %s18_s27, 128  ;;  %p312_p12 = scmp.lt.s32.totalorder %s18_s27, %s18_s27 }
  0x1c   :  { %p308_p11 = scmp.ne.s32.totalorder %s18_s27, %s307_s1  ;;  %p313_p13 = scmp.lt.s32.totalorder %s307_s1, %s307_s1 }
  0x1e   :  { %p314_p0 = por %p313_p13, %p312_p12 }
  0x20   :  { %p315_p1 = pnand %p314_p0, %p308_p11 }
  0x22   :  { %318 = shalt.err (!%p315_p1)
}
  0x23   :  { %20 = dma.hbm_to_vmem [thread:$0]  %s455_s0, 128, %s18_s27, [#allocation3]  }
  0x24   :  { %s319_s14 = scalar_lea.hbm %s457_s2, 256 }
  0x25   :  { %p320_p2 = scmp.ne.s32.totalorder %s457_s2, %s319_s14  ;;  %p323_p3 = scmp.lt.u32.totalorder %s319_s14, %s457_s2 }
  0x27   :  { %p325_p4 = pnand %p323_p3, %p320_p2 }
  0x29   :  { %328 = shalt.err (!%p325_p4)
}
  0x2a   :  { %s329_s19 = scalar_lea.vmem %s39_s29, 256  ;;  %p334_p6 = scmp.lt.s32.totalorder %s39_s29, %s39_s29 }
  0x2b   :  { %p330_p5 = scmp.ne.s32.totalorder %s39_s29, %s329_s19  ;;  %p335_p7 = scmp.lt.s32.totalorder %s329_s19, %s329_s19 }
  0x2d   :  { %p336_p8 = por %p335_p7, %p334_p6 }
  0x2f   :  { %p337_p9 = pnand %p336_p8, %p330_p5 }
  0x31   :  { %340 = shalt.err (!%p337_p9)
}
  0x32   :  { %44 = dma.hbm_to_vmem [thread:$0]  %s457_s2, 256, %s39_s29, [#allocation6], %s370_s22, %s370_s22, %s371_s23  }
  0x33   :  { %363 = dma.done.wait [#allocation3], 128  }
  0x34   :  { %364 = vsyncadd [#allocation3], 4294967168 }
  0x35   :  { %365 = dma.done.wait [#allocation6], 512  }
  0x36   :  { %366 = vsyncadd [#allocation6], 4294966784  ;;  %v374_v0 = vmov 0.0|0.0   ;;  %vm375_vm0 = vmmov 0   ;;  %v376_v1 = vmov 0.0   ;;  %v55_v2 = vld [vmem:[#allocation5] sm:$0xff]  ;;  %v127_v6 = vlaneseq }
  0x37   :  { %256 = vmatprep.subr.bf16.mxu0 %v374_v0  ;;  %246 = vmatprep.mubr.msk.f32.mxu0 %vm375_vm0, %v376_v1  ;;  %v56_v3 = vld [vmem:[#allocation5 + $0x8] sm:$0xff]  ;;  %v54_v5 = vld [vmem:[#allocation2] sm:$0xff]  ;;  %vm131_vm2 = vcmask 130048   ;;  %v143_v17 = vld [vmem:[#allocation7] sm:$0xff]  ;;  %s377_s2 = smov [#allocation8]  }
  0x38   :  { %259 = vmatprep.subr.bf16.mxu1 %v374_v0  ;;  %253 = vmatprep.mubr.msk.f32.mxu1 %vm375_vm0, %v376_v1  ;;  %v257_v4 = vpack.c.bf16 %v56_v3, %v55_v2  ;;  %v128_v7 = vand.u32 127, %v127_v6  ;;  %v144_v18 = vld [vmem:[#allocation7 + $0x8] sm:$0xff]  ;;  %s225_s21 = sshll.u32 %s377_s2, 4  ;;  %s226_s21 = int_to_ptr.vmem [resolvable:$true] %s225_s21 }
  0x39   :  { %v260_v19 = vpack.c.bf16 %v144_v18, %v143_v17  ;;  %s341_s22 = scalar_lea.vmem %s226_s21, 128  ;;  %p346_p11 = scmp.lt.s32.totalorder %s226_s21, %s226_s21 }
  0x3a   :  { %258 = vmatpush3.bf16.xpose.msra.mxu0 %v257_v4  ;;  %vm129_vm1 = vcmp.lt.s32.totalorder %v128_v7, 13  ;;  %p342_p10 = scmp.ne.s32.totalorder %s226_s21, %s341_s22  ;;  %p347_p12 = scmp.lt.s32.totalorder %s341_s22, %s341_s22 }
  0x3b   :  { %261 = vmatpush3.bf16.msra.mxu1 %v260_v19 }
  0x3c   :  { %p348_p13 = por %p347_p12, %p346_p11 }
  0x3e   :  { %p349_p0 = pnand %p348_p13, %p342_p10 }
  0x41   :  { %247 = vmatmul.mubr.f32.vlgmr.msra.gmra.mrb[0].mxu0 %v54_v5 }
 0x114   :  { %v123_v8 = vpop.f32.mrb[0].mxu0 }
 0x115   :  { %v130_v9 = vsel %vm129_vm1, %v123_v8, -1e+30  ;;  %v248_v10 = vpop.f32.mrb[1].mxu0 }
 0x116   :  { %v132_v11 = vsel %vm131_vm2, %v130_v9, -inf }
 0x117   :  { %133 = vmax.xlane.f32.xlu0 %v132_v11 }
 0x1a4   :  { %v134_v12 = vpop.xlane.xlu0 %133 }
 0x1a5   :  { %v135_v13 = vsub.f32 %v130_v9, %v134_v12 }
 0x1a7   :  { %v136_v14 = vmul.f32 1.442695, %v135_v13 }
 0x1a9   :  { %271 = vpow2.f32 %v136_v14 }
 0x1b3   :  { %v272_v15 = vpop.eup %271 }
 0x1b4   :  { %v138_v16 = vsel %vm131_vm2, %v272_v15, 0.0 }
 0x1b5   :  { %139 = vadd.xlane.f32.xlu0 %v138_v16 }
 0x242   :  { %v140_v20 = vpop.xlane.xlu0 %139 }
 0x243   :  { %273 = vrcp.f32 %v140_v20 }
 0x24d   :  { %v274_v21 = vpop.eup %273 }
 0x24e   :  { %v142_v22 = vmul.f32 %v274_v21, %v272_v15 }
 0x250   :  { %254 = vmatmul.mubr.msk.f32.vlgmr.msra.gmra.mrb[0].mxu1 %vm131_vm2, %v142_v22 }
 0x323   :  { %v214_v23 = vpop.f32.mrb[0].mxu1 }
 0x324   :  { %218 = vst [vmem:[#allocation8] sm:$0xff] %v214_v23  ;;  %v255_v24 = vpop.f32.mrb[1].mxu1 }
 0x325   :  { %352 = shalt.err (!%p349_p0)
}
 0x326   :  { %s353_s25 = scalar_lea.hbm %s458_s3, 128 }
 0x327   :  { %p354_p1 = scmp.ne.s32.totalorder %s458_s3, %s353_s25  ;;  %p357_p2 = scmp.lt.u32.totalorder %s353_s25, %s458_s3 }
 0x329   :  { %p359_p3 = pnand %p357_p2, %p354_p1 }
 0x32b   :  { %362 = shalt.err (!%p359_p3)
}
 0x32c   :  { %228 = dma.vmem_to_hbm [thread:$0]  %s226_s21, 128, %s458_s3, [#allocation4]  }
 0x32d   :  { %367 = dma.done.wait [#allocation4], 128  }
 0x32e   :  { %368 = vsyncadd [#allocation4], 4294967168 }
 0x32f   :  { %232 = vsyncpa [#allocation3], 1 }
 0x330   :  { %233 = vsyncpa [#allocation6], 1 }
 0x331   :  { %234 = vsyncpa [#allocation4], 1 }

</bundles_post_ra>
